<compile_context>
chip_gen: v7x
topology: tpu7x:2x2x1
jax: 0.10.0
libtpu: 0.0.40
codegen_flags: <defaults>
</compile_context>

<pallas_src>
import functools

import jax
import jax.numpy as jnp
from jax.experimental import pallas as pl
from jax.experimental.pallas import tpu as pltpu


def _selector_kernel(xT_ref, w1_ref, b1_ref, w2_ref, b2_ref, oT_ref):
    # xT_ref: (D, TN)   lane-dense input column-tile (rows of x on lanes)
    # w1_ref: (H, D)    resident
    # b1_ref: (H, 1)
    # w2_ref: (D, H)    resident
    # b2_ref: (D, 1)
    # oT_ref: (D, TN)
    xT = xT_ref[...]
    h = jnp.dot(w1_ref[...], xT, preferred_element_type=jnp.float32) + b1_ref[...]
    h = jnp.maximum(h, 0.0)                      # ReLU
    # Dropout(0.2): identity in eval mode.
    out = jnp.dot(w2_ref[...], h.astype(w2_ref.dtype),
                  preferred_element_type=jnp.float32) + b2_ref[...]
    oT_ref[...] = out.astype(oT_ref.dtype)


@functools.partial(jax.jit, static_argnames=("tn",))
def selector_forward(x, w1, b1, w2, b2, *, tn=512):
    """x: [..., dim]; w1: [h, dim]; b1: [h]; w2: [dim, h]; b2: [dim]."""
    orig_shape = x.shape
    dim = orig_shape[-1]
    h_dim = w1.shape[0]
    x2 = x.reshape(-1, dim)
    n = x2.shape[0]

    # Lane-dense layout: pad flattened row count up to a 128-lane multiple,
    # then up to a tile multiple (no divisibility assert).
    n_pad = ((n + 127) // 128) * 128
    tn_eff = min(tn, n_pad)
    n_pad = pl.cdiv(n_pad, tn_eff) * tn_eff

    xT = jnp.zeros((dim, n_pad), x.dtype).at[:, :n].set(x2.T)
    b1c = b1.reshape(h_dim, 1)
    b2c = b2.reshape(dim, 1)

    itemsize = jnp.dtype(x.dtype).itemsize
    cost = pl.CostEstimate(
        flops=4 * n_pad * dim * h_dim,
        transcendentals=0,
        bytes_accessed=(2 * n_pad * dim + 2 * dim * h_dim + h_dim + dim) * itemsize,
    )

    outT = pl.pallas_call(
        _selector_kernel,
        out_shape=jax.ShapeDtypeStruct((dim, n_pad), x.dtype),
        grid_spec=pltpu.PrefetchScalarGridSpec(
            num_scalar_prefetch=0,
            grid=(n_pad // tn_eff,),
            in_specs=[
                pl.BlockSpec((dim, tn_eff), lambda i: (0, i)),   # X^T column-tile
                pl.BlockSpec((h_dim, dim), lambda i: (0, 0)),    # W1 (resident)
                pl.BlockSpec((h_dim, 1), lambda i: (0, 0)),      # b1
                pl.BlockSpec((dim, h_dim), lambda i: (0, 0)),    # W2 (resident)
                pl.BlockSpec((dim, 1), lambda i: (0, 0)),        # b2
            ],
            out_specs=pl.BlockSpec((dim, tn_eff), lambda i: (0, i)),
        ),
        compiler_params=pltpu.CompilerParams(
            dimension_semantics=("parallel",)),
        cost_estimate=cost,
    )(xT, w1, b1c, w2, b2c)

    out = outT[:, :n].T
    return out.reshape(orig_shape)


def init_params(key, dim, h_dim, dtype=jnp.float32):
    """Deterministic init mimicking torch.nn.Linear default (uniform +-1/sqrt(fan_in))."""
    k1, k2, k3, k4 = jax.random.split(key, 4)
    bound1 = 1.0 / (dim ** 0.5)
    bound2 = 1.0 / (h_dim ** 0.5)
    w1 = jax.random.uniform(k1, (h_dim, dim), dtype, -bound1, bound1)
    b1 = jax.random.uniform(k2, (h_dim,), dtype, -bound1, bound1)
    w2 = jax.random.uniform(k3, (dim, h_dim), dtype, -bound2, bound2)
    b2 = jax.random.uniform(k4, (dim,), dtype, -bound2, bound2)
    return w1, b1, w2, b2


if __name__ == "__main__":
    # configs.enc_in = 16, configs.actor_h_dim = 32
    enc_in, actor_h_dim = 16, 32

    key = jax.random.PRNGKey(0)
    kx, kx2, kp = jax.random.split(key, 3)
    w1, b1, w2, b2 = init_params(kp, enc_in, actor_h_dim)

    def ref_fn(x):
        h_ref = jnp.maximum(x @ w1.T + b1, 0.0)
        return h_ref @ w2.T + b2

    # Case 1: small batch x seq (rows padded up to one 128-lane tile).
    batch, seq = 2, 8
    x = jax.random.normal(kx, (batch, seq, enc_in), dtype=jnp.float32)
    prob = selector_forward(x, w1, b1, w2, b2)
    jax.block_until_ready(prob)
    assert prob.shape == x.shape
    assert jnp.allclose(prob, ref_fn(x), atol=1e-5, rtol=1e-5)

    # Case 2: row count not a multiple of the tile (exercises padding path).
    x_odd = jax.random.normal(kx2, (3, 7, enc_in), dtype=jnp.float32)
    prob_odd = selector_forward(x_odd, w1, b1, w2, b2)
    jax.block_until_ready(prob_odd)
    assert prob_odd.shape == x_odd.shape
    assert jnp.allclose(prob_odd, ref_fn(x_odd), atol=1e-5, rtol=1e-5)

    print("KERNEL_OK")
</pallas_src>

<mosaic_0001>
module attributes {stable_mosaic.version = 11 : i64} {
  func.func @_selector_kernel(%arg0: i32, %arg1: memref<16x128xf32, #tpu.memory_space<vmem>>, %arg2: memref<32x16xf32, #tpu.memory_space<vmem>>, %arg3: memref<32x1xf32, #tpu.memory_space<vmem>>, %arg4: memref<16x32xf32, #tpu.memory_space<vmem>>, %arg5: memref<16x1xf32, #tpu.memory_space<vmem>>, %arg6: memref<16x128xf32, #tpu.memory_space<vmem>>) attributes {dimension_semantics = [#tpu.dimension_semantics<parallel>], iteration_bounds = array<i64: 1>, scalar_prefetch = 0 : i64, scratch_operands = 0 : i64, tpu.core_type = #tpu.core_type<tc>, window_params = [{transform_indices = @transform_0, window_bounds = array<i64: 16, 128>}, {pipeline_mode = #tpu.pipeline_mode<synchronous>, transform_indices = @transform_1, window_bounds = array<i64: 32, 16>}, {pipeline_mode = #tpu.pipeline_mode<synchronous>, transform_indices = @transform_2, window_bounds = array<i64: 32, 1>}, {pipeline_mode = #tpu.pipeline_mode<synchronous>, transform_indices = @transform_3, window_bounds = array<i64: 16, 32>}, {pipeline_mode = #tpu.pipeline_mode<synchronous>, transform_indices = @transform_4, window_bounds = array<i64: 16, 1>}, {transform_indices = @transform_5, window_bounds = array<i64: 16, 128>}]} {
    %c0 = arith.constant 0 : index
    %c0_0 = arith.constant 0 : index
    %0 = vector.load %arg1[%c0, %c0_0] : memref<16x128xf32, #tpu.memory_space<vmem>>, vector<16x128xf32>
    %c0_1 = arith.constant 0 : index
    %c0_2 = arith.constant 0 : index
    %1 = vector.load %arg2[%c0_1, %c0_2] : memref<32x16xf32, #tpu.memory_space<vmem>>, vector<32x16xf32>
    %cst = arith.constant dense<0.000000e+00> : vector<32x128xf32>
    %2 = tpu.matmul %1, %0, %cst {dimension_numbers = #tpu.dot_dimension_numbers<[1], [0], [0], [1], [0, 0, 1, 1], [], []>} : vector<32x16xf32>, vector<16x128xf32>, vector<32x128xf32> -> vector<32x128xf32>
    %c0_3 = arith.constant 0 : index
    %c0_4 = arith.constant 0 : index
    %3 = vector.load %arg3[%c0_3, %c0_4] : memref<32x1xf32, #tpu.memory_space<vmem>>, vector<32x1xf32>
    %4 = vector.broadcast %3 : vector<32x1xf32> to vector<32x128xf32>
    %5 = arith.addf %2, %4 : vector<32x128xf32>
    %cst_5 = arith.constant 0.000000e+00 : f32
    %6 = vector.broadcast %cst_5 : f32 to vector<32x128xf32>
    %7 = arith.maximumf %5, %6 : vector<32x128xf32>
    %c0_6 = arith.constant 0 : index
    %c0_7 = arith.constant 0 : index
    %8 = vector.load %arg4[%c0_6, %c0_7] : memref<16x32xf32, #tpu.memory_space<vmem>>, vector<16x32xf32>
    %cst_8 = arith.constant dense<0.000000e+00> : vector<16x128xf32>
    %9 = tpu.matmul %8, %7, %cst_8 {dimension_numbers = #tpu.dot_dimension_numbers<[1], [0], [0], [1], [0, 0, 1, 1], [], []>} : vector<16x32xf32>, vector<32x128xf32>, vector<16x128xf32> -> vector<16x128xf32>
    %c0_9 = arith.constant 0 : index
    %c0_10 = arith.constant 0 : index
    %10 = vector.load %arg5[%c0_9, %c0_10] : memref<16x1xf32, #tpu.memory_space<vmem>>, vector<16x1xf32>
    %11 = vector.broadcast %10 : vector<16x1xf32> to vector<16x128xf32>
    %12 = arith.addf %9, %11 : vector<16x128xf32>
    %c0_11 = arith.constant 0 : index
    %c0_12 = arith.constant 0 : index
    %13 = vector.load %arg6[%c0_11, %c0_12] : memref<16x128xf32, #tpu.memory_space<vmem>>, vector<16x128xf32>
    tpu.vector_store %arg6[%c0_11, %c0_12], %12 {strides = array<i32>} : memref<16x128xf32, #tpu.memory_space<vmem>>, vector<16x128xf32>,
    return
  }
  func.func @transform_0(%arg0: i32) -> (i32, i32) {
    %c0_i32 = arith.constant 0 : i32
    %c0_i32_0 = arith.constant 0 : i32
    return %c0_i32, %arg0 : i32, i32
  }
  func.func @transform_1(%arg0: i32) -> (i32, i32) {
    %c0_i32 = arith.constant 0 : i32
    %c0_i32_0 = arith.constant 0 : i32
    %c0_i32_1 = arith.constant 0 : i32
    return %c0_i32, %c0_i32_0 : i32, i32
  }
  func.func @transform_2(%arg0: i32) -> (i32, i32) {
    %c0_i32 = arith.constant 0 : i32
    %c0_i32_0 = arith.constant 0 : i32
    %c0_i32_1 = arith.constant 0 : i32
    return %c0_i32, %c0_i32_0 : i32, i32
  }
  func.func @transform_3(%arg0: i32) -> (i32, i32) {
    %c0_i32 = arith.constant 0 : i32
    %c0_i32_0 = arith.constant 0 : i32
    %c0_i32_1 = arith.constant 0 : i32
    return %c0_i32, %c0_i32_0 : i32, i32
  }
  func.func @transform_4(%arg0: i32) -> (i32, i32) {
    %c0_i32 = arith.constant 0 : i32
    %c0_i32_0 = arith.constant 0 : i32
    %c0_i32_1 = arith.constant 0 : i32
    return %c0_i32, %c0_i32_0 : i32, i32
  }
  func.func @transform_5(%arg0: i32) -> (i32, i32) {
    %c0_i32 = arith.constant 0 : i32
    %c0_i32_0 = arith.constant 0 : i32
    return %c0_i32, %arg0 : i32, i32
  }
}

</mosaic_0001>

<bundles_post_ra>
// kernel: selector_forward.1
= control target key start
LH: loop header
LB: loop body
LE: loop exit
PB: predicated region body
PF: predicated region fallthrough
CT: control target
= control target key end

     0   :  { %vm50_vm0 = vcmask 130048   ;;  %v308_v3 = vmov 0   ;;  %vm166_vm1 = vcmask 261120   ;;  %s393_s0 = inlined_call_operand.vmem [shape: f32[16,128], index: 0, kind: input, shape index: {}]   ;;  %s394_s1 = inlined_call_operand.vmem [shape: f32[32,16], index: 1, kind: input, shape index: {}]   ;;  %s395_s2 = inlined_call_operand.vmem [shape: f32[32,1], index: 2, kind: input, shape index: {}]   ;;  %s396_s4 = inlined_call_operand.vmem [shape: f32[16,1], index: 4, kind: input, shape index: {}]   ;;  %s397_s3 = inlined_call_operand.vmem [shape: f32[16,32], index: 3, kind: input, shape index: {}]   ;;  %s398_s5 = inlined_call_operand.vmem [shape: f32[16,128], index: 5, kind: output, shape index: {}]  }
   0x1   :  { %v20_v0 = vld [vmem:[%s393_s0] sm:$0xff]  ;;  %v21_v1 = vld [vmem:[%s393_s0 + $0x8] sm:$0xff]  ;;  %306 = vset.pattern.permute.xlu0 %v308_v3  ;;  %307 = vset.pattern.permute.xlu1 %v308_v3  ;;  %v28_v6 = vld [vmem:[%s395_s2 + $0x10] sm:$0xff] }
   0x2   :  { %v22_v2 = vld [vmem:[%s394_s1] sm:$0xff]  ;;  %v293_v4 = vpack.c.bf16 %v21_v1, %v20_v0  ;;  %v23_v7 = vld [vmem:[%s394_s1 + $0x8] sm:$0xff]  ;;  %42 = vperm.xlu1 %307, %v28_v6   ;;  %v24_v9 = vld [vmem:[%s394_s1 + $0x10] sm:$0xff] }
   0x3   :  { %276 = vmatprep.mubr.msk.f32.mxu0 %vm50_vm0, %v22_v2  ;;  %v26_v5 = vld [vmem:[%s395_s2] sm:$0xff]  ;;  %v27_v8 = vld [vmem:[%s395_s2 + $0x8] sm:$0xff]  ;;  %v29_v10 = vld [vmem:[%s395_s2 + $0x18] sm:$0xff] }
   0x4   :  { %294 = vmatprep.subr.bf16.mxu0 %v293_v4  ;;  %32 = vperm.xlu0 %306, %v26_v5   ;;  %v25_v11 = vld [vmem:[%s394_s1 + $0x18] sm:$0xff]  ;;  %v154_v12 = vld [vmem:[%s396_s4] sm:$0xff]  ;;  %v155_v13 = vld [vmem:[%s396_s4 + $0x8] sm:$0xff] }
   0x5   :  { %296 = vmatpush3.bf16.msra.mxu0 %v293_v4  ;;  %v152_v14 = vld [vmem:[%s397_s3] sm:$0xff]  ;;  %v153_v33 = vld [vmem:[%s397_s3 + $0x8] sm:$0xff] }
   0x6   :  { %47 = vperm.xlu1 %307, %v29_v10   ;;  %290 = vmatprep.mubr.msk.f32.mxu1 %vm166_vm1, %v152_v14 }
   0x8   :  { %277 = vmatmul.mubr.msk.f32.vlgmr.msra.gmra.mrb[0].mxu0 %vm50_vm0, %v23_v7  ;;  %37 = vperm.xlu0 %306, %v27_v8  }
   0x9   :  { %279 = vmatprep.mubr.msk.f32.mxu0 %vm50_vm0, %v24_v9 }
   0xa   :  { %163 = vperm.xlu1 %307, %v155_v13  }
   0xc   :  { %280 = vmatmul.mubr.msk.f32.gmra.mrb[2].mxu0 %vm50_vm0, %v25_v11  ;;  %158 = vperm.xlu0 %306, %v154_v12  }
  0x81   :  { %v43_v16 = vpop.permute.xlu1 %42 }
  0x83   :  { %v33_v15 = vpop.permute.xlu0 %32 }
  0x85   :  { %v48_v23 = vpop.permute.xlu1 %47 }
  0x87   :  { %v38_v17 = vpop.permute.xlu0 %37 }
  0x89   :  { %v164_v34 = vpop.permute.xlu1 %163 }
  0x8b   :  { %v159_v36 = vpop.permute.xlu0 %158 }
  0xdb   :  { %v278_v18 = vpop.f32.mrb[0].mxu0 }
  0xdc   :  { %v135_v19 = vadd.f32 %v278_v18, %v38_v17  ;;  %v129_v20 = vpop.f32.mrb[1].mxu0 }
  0xdd   :  { %v130_v21 = vadd.f32 %v129_v20, %v33_v15 }
  0xde   :  { %v149_v22 = vmax.f32 %v135_v19, 0.0 }
  0xdf   :  { %v148_v24 = vmax.f32 %v130_v21, 0.0  ;;  %v281_v25 = vpop.f32.mrb[2].mxu0 }
  0xe0   :  { %v145_v26 = vadd.f32 %v281_v25, %v48_v23  ;;  %v139_v27 = vpop.f32.mrb[3].mxu0 }
  0xe1   :  { %v140_v28 = vadd.f32 %v139_v27, %v43_v16  ;;  %v297_v29 = vpack.c.bf16 %v149_v22, %v148_v24 }
  0xe2   :  { %v151_v30 = vmax.f32 %v145_v26, 0.0 }
  0xe3   :  { %v150_v31 = vmax.f32 %v140_v28, 0.0  ;;  %298 = vmatprep.subr.bf16.mxu1 %v297_v29 }
  0xe4   :  { %300 = vmatpush3.bf16.msra.mxu1 %v297_v29 }
  0xe5   :  { %v301_v32 = vpack.c.bf16 %v151_v30, %v150_v31 }
  0xe7   :  { %302 = vmatprep.subr.bf16.mxu1 %v301_v32 }
  0xe8   :  { %304 = vmatpush3.bf16.msra.mxu1 %v301_v32 }
  0xeb   :  { %291 = vmatmul.mubr.msk.f32.vlgmr.msra.gmra.mrb[0].mxu1 %vm166_vm1, %v153_v33 }
 0x1be   :  { %v292_v35 = vpop.f32.mrb[0].mxu1 }
 0x1bf   :  { %v245_v37 = vadd.f32 %v292_v35, %v164_v34  ;;  %v239_v38 = vpop.f32.mrb[1].mxu1 }
 0x1c0   :  { %v240_v39 = vadd.f32 %v239_v38, %v159_v36 }
 0x1c1   :  { %249 = vst [vmem:[%s398_s5 + $0x8] sm:$0xff] %v245_v37 }
 0x1c2   :  { %248 = vst [vmem:[%s398_s5] sm:$0xff] %v240_v39 }

</bundles_post_ra>
